<compile_context>
chip_gen: v5e
topology: v5e:2x2
jax: 0.10.0
libtpu: 0.0.40
codegen_flags: <defaults>
</compile_context>

<pallas_src>
import functools
import math

import jax
import jax.numpy as jnp
from jax.experimental import pallas as pl
from jax.experimental.pallas import tpu as pltpu


def _round_up(x, m):
    return (x + m - 1) // m * m


# --------------------------------------------------------------------------
# Kernel
# --------------------------------------------------------------------------
def duality_kernel(x_ref, wsa_ref, bsa_ref, wprod_ref, bprod_ref, o_ref,
                   *, tn, epsilon):
    x = x_ref[...]                                   # [TB, In_pad] f32
    cdt = wsa_ref.dtype                              # MXU operand dtype
    x_c = x.astype(cdt)

    # ---- fused (sum | alpha) matmul: shared LHS, one wide MXU op ----
    sa = jnp.dot(x_c, wsa_ref[...],
                 preferred_element_type=jnp.float32)          # [TB, 2*TN] f32
    sa = sa + bsa_ref[...]                                    # bias in f32
    sum_path = sa[:, :tn]
    alpha = jax.nn.sigmoid(sa[:, tn:])

    # ---- product path: exp(log(x+eps) @ W_prod) + b_prod ----
    # With the collapsed output grid this log runs once per batch tile.
    log_x = jnp.log(x + epsilon)                              # f32 (EUP)
    prod_log = jnp.dot(log_x.astype(cdt), wprod_ref[...],
                       preferred_element_type=jnp.float32)    # [TB, TN] f32
    prod_path = jnp.exp(prod_log) + bprod_ref[...]

    # ---- combine + relu (prod + alpha*(sum - prod): saves one VPU mul) ----
    out = prod_path + alpha * (sum_path - prod_path)
    o_ref[...] = jnp.maximum(out, 0.0).astype(o_ref.dtype)


# --------------------------------------------------------------------------
# One-time parameter preparation (hoisted out of the per-call hot path)
# --------------------------------------------------------------------------
def prepare_duality_params(w_sum, b_sum, w_prod, b_prod, alpha_w, alpha_b,
                           *, tn=None, compute_dtype=jnp.float32,
                           vmem_weight_budget_bytes=12 * 1024 * 1024):
    """Torch layout weights are [Out, In]; transpose/pad/fuse/cast once.

    tn=None (default): collapse the output-tile axis (tn = padded Out) whenever
    the double-buffered fused weight slab fits `vmem_weight_budget_bytes`;
    otherwise pick the largest 256-multiple (min 128) that does.
    """
    out_f, in_f = w_sum.shape
    in_pad = _round_up(in_f, 128)            # lane-dense LHS / full MXU K feed
    out_pad0 = _round_up(out_f, 128)         # lane-dense output
    itemsize = jnp.dtype(compute_dtype).itemsize

    if tn is None:
        # Per-tile weight bytes (fused 2*tn + prod tn), double-buffered.
        full_bytes = 2 * in_pad * 3 * out_pad0 * itemsize
        if full_bytes <= vmem_weight_budget_bytes:
            tn = out_pad0                     # collapse -> 1 output tile
        else:
            per_col = 2 * in_pad * 3 * itemsize
            tn = max(128, (vmem_weight_budget_bytes // per_col) // 256 * 256)
            tn = min(tn, out_pad0)
    if tn % 128 != 0:
        raise ValueError(f"tn must be a multiple of 128, got {tn}")
    out_pad = _round_up(out_pad0, tn)
    n_t = out_pad // tn

    def prep_w(w):                            # [Out, In] -> [In_pad, Out_pad] f32
        wt = jnp.asarray(w, jnp.float32).T
        return jnp.pad(wt, ((0, in_pad - in_f), (0, out_pad - out_f)))

    def prep_b(b):                            # [Out] -> [Out_pad] f32
        return jnp.pad(jnp.asarray(b, jnp.float32), (0, out_pad - out_f))

    ws, wp, wa = prep_w(w_sum), prep_w(w_prod), prep_w(alpha_w)
    bs, bp, ba = prep_b(b_sum), prep_b(b_prod), prep_b(alpha_b)

    # Fuse sum + alpha weights, tile-interleaved along Out so every
    # (In_pad, 2*tn) block holds [sum tile_j | alpha tile_j].
    w_sa = jnp.concatenate(
        [ws.reshape(in_pad, n_t, tn), wa.reshape(in_pad, n_t, tn)], axis=2)
    w_sa = w_sa.reshape(in_pad, n_t * 2 * tn).astype(compute_dtype)
    b_sa = jnp.concatenate(
        [bs.reshape(n_t, tn), ba.reshape(n_t, tn)], axis=1)
    b_sa = b_sa.reshape(1, n_t * 2 * tn)                       # f32

    return {
        "w_sa": w_sa,                                          # [In_pad, 2*Out_pad]
        "b_sa": b_sa,                                          # [1, 2*Out_pad]
        "w_prod": wp.astype(compute_dtype),                    # [In_pad, Out_pad]
        "b_prod": bp.reshape(1, out_pad),                      # [1, Out_pad]
        "in_features": in_f,
        "in_pad": in_pad,
        "out_features": out_f,
        "tn": tn,
    }


# --------------------------------------------------------------------------
# Forward wrapper
# --------------------------------------------------------------------------
def duality_layer(x, params, *, epsilon=1e-6, tb=256):
    """x: [B, in_features] float. Returns [B, out_features] float32."""
    B, in_f = x.shape
    assert in_f == params["in_features"], "in_features mismatch between x and params"
    in_pad = params["in_pad"]
    out_f = params["out_features"]
    tn = params["tn"]
    w_sa, b_sa = params["w_sa"], params["b_sa"]
    w_prod, b_prod = params["w_prod"], params["b_prod"]
    out_pad = w_prod.shape[1]

    # Batch tiling: fill sublanes (>=8 rows).  Padded rows/cols use 1.0
    # (log(1+eps) ~ 0, weights there are 0) so they are numerically tame;
    # they contribute nothing to valid outputs and are sliced away.
    TB = min(tb, _round_up(B, 8))
    b_pad = _round_up(B, TB)
    x_p = jnp.asarray(x, jnp.float32)
    if b_pad != B or in_pad != in_f:
        x_p = jnp.pad(x_p, ((0, b_pad - B), (0, in_pad - in_f)),
                      constant_values=1.0)

    # With the default collapsed tn, the second grid axis has a single entry:
    # weights are VMEM-resident, log(x+eps) runs once per batch tile, and the
    # output store is one wide lane-dense slab.
    grid = (b_pad // TB, out_pad // tn)
    kernel = functools.partial(duality_kernel, tn=tn, epsilon=epsilon)

    out = pl.pallas_call(
        kernel,
        out_shape=jax.ShapeDtypeStruct((b_pad, out_pad), jnp.float32),
        grid=grid,
        in_specs=[
            pl.BlockSpec((TB, in_pad), lambda i, j: (i, 0)),       # x
            pl.BlockSpec((in_pad, 2 * tn), lambda i, j: (0, j)),   # W_sum|W_alpha
            pl.BlockSpec((1, 2 * tn), lambda i, j: (0, j)),        # b_sum|b_alpha
            pl.BlockSpec((in_pad, tn), lambda i, j: (0, j)),       # W_prod
            pl.BlockSpec((1, tn), lambda i, j: (0, j)),            # b_prod
        ],
        out_specs=pl.BlockSpec((TB, tn), lambda i, j: (i, j)),
        compiler_params=pltpu.CompilerParams(
            dimension_semantics=("parallel", "parallel"),
            vmem_limit_bytes=32 * 1024 * 1024,
        ),
    )(x_p, w_sa, b_sa, w_prod, b_prod)

    return out[:B, :out_f]


# --------------------------------------------------------------------------
# Pure-JAX reference (matches the PyTorch forward)
# --------------------------------------------------------------------------
def _reference(x, w_sum, b_sum, w_prod, b_prod, alpha_w, alpha_b, epsilon=1e-6):
    sum_path = x @ w_sum.T + b_sum
    prod_path = jnp.exp(jnp.log(x + epsilon) @ w_prod.T) + b_prod
    alpha = jax.nn.sigmoid(x @ alpha_w.T + alpha_b)
    return jnp.maximum(alpha * sum_path + (1 - alpha) * prod_path, 0.0)


# --------------------------------------------------------------------------
# Demo / self-check
# --------------------------------------------------------------------------
def _make_params(key, in_f, out_f):
    k_ws, k_bs, k_wp, k_bp, k_wa, k_ba = jax.random.split(key, 6)
    bound_w = math.sqrt(6.0 / in_f) / math.sqrt(1.0 + 5.0)   # kaiming-ish, a=sqrt(5)
    bound_b = 1.0 / math.sqrt(in_f)
    w_sum = jax.random.uniform(k_ws, (out_f, in_f), jnp.float32, -bound_w, bound_w)
    b_sum = jax.random.uniform(k_bs, (out_f,), jnp.float32, -bound_b, bound_b)
    w_prod = jax.random.uniform(k_wp, (out_f, in_f), jnp.float32, -bound_w, bound_w)
    b_prod = jax.random.uniform(k_bp, (out_f,), jnp.float32, -bound_b, bound_b)
    # non-zero alpha params to exercise the adaptive-alpha path
    alpha_w = jax.random.uniform(k_wa, (out_f, in_f), jnp.float32, -0.1, 0.1)
    alpha_b = jax.random.uniform(k_ba, (out_f,), jnp.float32, -0.1, 0.1)
    return w_sum, b_sum, w_prod, b_prod, alpha_w, alpha_b


if __name__ == "__main__":
    key = jax.random.PRNGKey(0)

    # ---- case 1: tiny shapes matching the module spec (B=2, In=Out=32) ----
    k_p1, k_x1, k_p2, k_x2 = jax.random.split(key, 4)
    B, In, Out = 2, 32, 32
    ws, bs, wp, bp, aw, ab = _make_params(k_p1, In, Out)
    x = jax.random.uniform(k_x1, (B, In), jnp.float32, 0.25, 1.0)  # positive inputs
    ref = _reference(x, ws, bs, wp, bp, aw, ab)

    # exact (f32 compute, collapsed output grid) path
    params_f32 = prepare_duality_params(ws, bs, wp, bp, aw, ab,
                                        compute_dtype=jnp.float32)
    out_f32 = jax.block_until_ready(duality_layer(x, params_f32))
    assert out_f32.shape == (B, Out)
    assert jnp.allclose(out_f32, ref, atol=1e-4, rtol=1e-4), "f32 mismatch (small)"

    # fast (bf16 MXU operands, f32 accumulation) path
    params_bf16 = prepare_duality_params(ws, bs, wp, bp, aw, ab,
                                         compute_dtype=jnp.bfloat16)
    out_bf16 = jax.block_until_ready(duality_layer(x, params_bf16))
    assert jnp.allclose(out_bf16, ref, atol=5e-2, rtol=5e-2), "bf16 mismatch (small)"

    # ---- case 2: larger shapes, collapsed output axis (default tn=None) ----
    B2, In2, Out2 = 200, 256, 384
    ws2, bs2, wp2, bp2, aw2, ab2 = _make_params(k_p2, In2, Out2)
    x2 = jax.random.uniform(k_x2, (B2, In2), jnp.float32, 0.25, 1.0)
    ref2 = _reference(x2, ws2, bs2, wp2, bp2, aw2, ab2)

    params2 = prepare_duality_params(ws2, bs2, wp2, bp2, aw2, ab2,
                                     compute_dtype=jnp.float32)
    assert params2["tn"] == 384, "expected collapsed output tile at these sizes"
    out2 = jax.block_until_ready(duality_layer(x2, params2))
    assert out2.shape == (B2, Out2)
    assert jnp.allclose(out2, ref2, atol=2e-3, rtol=2e-3), "f32 mismatch (collapsed)"

    # ---- case 3: forced output tiling (tn=128) + batch tiling, padding path ----
    params3 = prepare_duality_params(ws2, bs2, wp2, bp2, aw2, ab2,
                                     tn=128, compute_dtype=jnp.float32)
    out3 = jax.block_until_ready(duality_layer(x2, params3, tb=128))
    assert out3.shape == (B2, Out2)
    assert jnp.allclose(out3, ref2, atol=2e-3, rtol=2e-3), "f32 mismatch (tiled)"

    print("KERNEL_OK")
</pallas_src>

<mosaic_0001>
module attributes {stable_mosaic.version = 11 : i64} {
  func.func @duality_kernel(%arg0: i32, %arg1: i32, %arg2: memref<8x128xf32, #tpu.memory_space<vmem>>, %arg3: memref<128x256xf32, #tpu.memory_space<vmem>>, %arg4: memref<1x256xf32, #tpu.memory_space<vmem>>, %arg5: memref<128x128xf32, #tpu.memory_space<vmem>>, %arg6: memref<1x128xf32, #tpu.memory_space<vmem>>, %arg7: memref<8x128xf32, #tpu.memory_space<vmem>>) attributes {dimension_semantics = [#tpu.dimension_semantics<parallel>, #tpu.dimension_semantics<parallel>], iteration_bounds = array<i64: 1, 1>, scalar_prefetch = 0 : i64, scratch_operands = 0 : i64, tpu.core_type = #tpu.core_type<tc>, window_params = [{transform_indices = @transform_0, window_bounds = array<i64: 8, 128>}, {transform_indices = @transform_1, window_bounds = array<i64: 128, 256>}, {transform_indices = @transform_2, window_bounds = array<i64: 1, 256>}, {transform_indices = @transform_3, window_bounds = array<i64: 128, 128>}, {transform_indices = @transform_4, window_bounds = array<i64: 1, 128>}, {transform_indices = @transform_5, window_bounds = array<i64: 8, 128>}]} {
    %c0 = arith.constant 0 : index
    %c0_0 = arith.constant 0 : index
    %0 = vector.load %arg2[%c0, %c0_0] : memref<8x128xf32, #tpu.memory_space<vmem>>, vector<8x128xf32>
    %c0_1 = arith.constant 0 : index
    %c0_2 = arith.constant 0 : index
    %1 = vector.load %arg3[%c0_1, %c0_2] : memref<128x256xf32, #tpu.memory_space<vmem>>, vector<128x256xf32>
    %cst = arith.constant dense<0.000000e+00> : vector<8x256xf32>
    %2 = tpu.matmul %0, %1, %cst {dimension_numbers = #tpu.dot_dimension_numbers<[1], [0], [0], [1], [0, 0, 1, 1], [], []>} : vector<8x128xf32>, vector<128x256xf32>, vector<8x256xf32> -> vector<8x256xf32>
    %c0_3 = arith.constant 0 : index
    %c0_4 = arith.constant 0 : index
    %3 = vector.load %arg4[%c0_3, %c0_4] : memref<1x256xf32, #tpu.memory_space<vmem>>, vector<1x256xf32>
    %4 = vector.broadcast %3 : vector<1x256xf32> to vector<8x256xf32>
    %5 = arith.addf %2, %4 : vector<8x256xf32>
    %6 = vector.extract_strided_slice %5 {offsets = [0, 0], sizes = [8, 128], strides = [1, 1]} : vector<8x256xf32> to vector<8x128xf32>
    %7 = vector.extract_strided_slice %5 {offsets = [0, 128], sizes = [8, 128], strides = [1, 1]} : vector<8x256xf32> to vector<8x128xf32>
    %8 = arith.negf %7 : vector<8x128xf32>
    %9 = math.exp %8 : vector<8x128xf32>
    %cst_5 = arith.constant 1.000000e+00 : f32
    %10 = vector.broadcast %cst_5 : f32 to vector<8x128xf32>
    %11 = arith.addf %10, %9 : vector<8x128xf32>
    %12 = arith.divf %10, %11 : vector<8x128xf32>
    %cst_6 = arith.constant 9.99999997E-7 : f32
    %13 = vector.broadcast %cst_6 : f32 to vector<8x128xf32>
    %14 = arith.addf %0, %13 : vector<8x128xf32>
    %15 = math.log %14 : vector<8x128xf32>
    %c0_7 = arith.constant 0 : index
    %c0_8 = arith.constant 0 : index
    %16 = vector.load %arg5[%c0_7, %c0_8] : memref<128x128xf32, #tpu.memory_space<vmem>>, vector<128x128xf32>
    %cst_9 = arith.constant dense<0.000000e+00> : vector<8x128xf32>
    %17 = tpu.matmul %15, %16, %cst_9 {dimension_numbers = #tpu.dot_dimension_numbers<[1], [0], [0], [1], [0, 0, 1, 1], [], []>} : vector<8x128xf32>, vector<128x128xf32>, vector<8x128xf32> -> vector<8x128xf32>
    %18 = math.exp %17 : vector<8x128xf32>
    %c0_10 = arith.constant 0 : index
    %c0_11 = arith.constant 0 : index
    %19 = vector.load %arg6[%c0_10, %c0_11] : memref<1x128xf32, #tpu.memory_space<vmem>>, vector<1x128xf32>
    %20 = vector.broadcast %19 : vector<1x128xf32> to vector<8x128xf32>
    %21 = arith.addf %18, %20 : vector<8x128xf32>
    %22 = arith.subf %6, %21 : vector<8x128xf32>
    %23 = arith.mulf %12, %22 : vector<8x128xf32>
    %24 = arith.addf %21, %23 : vector<8x128xf32>
    %cst_12 = arith.constant 0.000000e+00 : f32
    %25 = vector.broadcast %cst_12 : f32 to vector<8x128xf32>
    %26 = arith.maximumf %24, %25 : vector<8x128xf32>
    %c0_13 = arith.constant 0 : index
    %c0_14 = arith.constant 0 : index
    %27 = vector.load %arg7[%c0_13, %c0_14] : memref<8x128xf32, #tpu.memory_space<vmem>>, vector<8x128xf32>
    tpu.vector_store %arg7[%c0_13, %c0_14], %26 {strides = array<i32>} : memref<8x128xf32, #tpu.memory_space<vmem>>, vector<8x128xf32>,
    return
  }
  func.func @transform_0(%arg0: i32, %arg1: i32) -> (i32, i32) {
    %c0_i32 = arith.constant 0 : i32
    %c0_i32_0 = arith.constant 0 : i32
    return %arg0, %c0_i32 : i32, i32
  }
  func.func @transform_1(%arg0: i32, %arg1: i32) -> (i32, i32) {
    %c0_i32 = arith.constant 0 : i32
    %c0_i32_0 = arith.constant 0 : i32
    return %c0_i32, %arg1 : i32, i32
  }
  func.func @transform_2(%arg0: i32, %arg1: i32) -> (i32, i32) {
    %c0_i32 = arith.constant 0 : i32
    %c0_i32_0 = arith.constant 0 : i32
    return %c0_i32, %arg1 : i32, i32
  }
  func.func @transform_3(%arg0: i32, %arg1: i32) -> (i32, i32) {
    %c0_i32 = arith.constant 0 : i32
    %c0_i32_0 = arith.constant 0 : i32
    return %c0_i32, %arg1 : i32, i32
  }
  func.func @transform_4(%arg0: i32, %arg1: i32) -> (i32, i32) {
    %c0_i32 = arith.constant 0 : i32
    %c0_i32_0 = arith.constant 0 : i32
    return %c0_i32, %arg1 : i32, i32
  }
  func.func @transform_5(%arg0: i32, %arg1: i32) -> (i32, i32) {
    %c0_i32 = arith.constant 0 : i32
    return %arg0, %arg1 : i32, i32
  }
}

</mosaic_0001>

<bundles_post_ra>
// kernel: tpu_custom_call.1
= control target key start
LH: loop header
LB: loop body
LE: loop exit
PB: predicated region body
PF: predicated region fallthrough
CT: control target
= control target key end

     0   :  { %10 = vsyncpa [#allocation3], 0  ;;  %s457_s0 = inlined_call_operand.hbm [shape: f32[8,128], index: 0, kind: input, shape index: {}]   ;;  %s458_s1 = inlined_call_operand.hbm [shape: f32[128,256], index: 1, kind: input, shape index: {}]   ;;  %s459_s2 = inlined_call_operand.hbm [shape: f32[1,256], index: 2, kind: input, shape index: {}]   ;;  %s460_s3 = inlined_call_operand.hbm [shape: f32[128,128], index: 3, kind: input, shape index: {}]   ;;  %s461_s4 = inlined_call_operand.vmem [shape: f32[1,128], index: 4, kind: input, shape index: {}]   ;;  %s462_s5 = inlined_call_operand.hbm [shape: f32[8,128], index: 5, kind: output, shape index: {}]  }
   0x1   :  { %11 = vsyncpa [#allocation6], 0 }
   0x2   :  { %12 = vsyncpa [#allocation9], 0  ;;  %s29_s20 = sshll.u32 %s458_s1, 4  ;;  %s30_s20 = int_to_ptr.hbm [resolvable:$true] %s29_s20 }
   0x3   :  { %13 = vsyncpa [#allocation4], 0  ;;  %s395_s21 = smov [#allocation5]   ;;  %s19_s25 = sshll.u32 %s457_s0, 4  ;;  %s20_s25 = int_to_ptr.hbm [resolvable:$true] %s19_s25 }
   0x4   :  { %s31_s22 = sshll.u32 %s395_s21, 4  ;;  %s396_s26 = smov 256   ;;  %s32_s22 = int_to_ptr.vmem [resolvable:$true] %s31_s22 }
   0x5   :  { %s397_s27 = smov 16   ;;  %s398_s28 = smov [#allocation2]  }
   0x6   :  { %37 = dma.hbm_to_vmem [thread:$0]  %s30_s20, 4096, %s32_s22, [#allocation6], %s396_s26, %s396_s26, %s397_s27  }
   0x7   :  { %s21_s29 = sshll.u32 %s398_s28, 4  ;;  %s43_s7 = sshll.u32 %s459_s2, 4  ;;  %s22_s29 = int_to_ptr.vmem [resolvable:$true] %s21_s29  ;;  %s44_s7 = int_to_ptr.hbm [resolvable:$true] %s43_s7 }
   0x8   :  { %24 = dma.hbm_to_vmem [thread:$0]  %s20_s25, 128, %s22_s29, [#allocation3]  }
   0x9   :  { %s53_s9 = sshll.u32 %s460_s3, 4  ;;  %s399_s10 = smov [#allocation7]   ;;  %s54_s9 = int_to_ptr.hbm [resolvable:$true] %s53_s9 }
   0xa   :  { %s45_s11 = sshll.u32 %s399_s10, 4  ;;  %s400_s0 = smov [#allocation8]   ;;  %s46_s11 = int_to_ptr.vmem [resolvable:$true] %s45_s11 }
   0xb   :  { %48 = dma.hbm_to_vmem [thread:$0]  %s44_s7, 32, %s46_s11, [#allocation6]  }
   0xc   :  { %s55_s12 = sshll.u32 %s400_s0, 4  ;;  %s401_s13 = smov 128   ;;  %s56_s12 = int_to_ptr.vmem [resolvable:$true] %s55_s12 }
   0xd   :  { %s402_s14 = smov 8  }
   0xe   :  { %61 = dma.hbm_to_vmem [thread:$0]  %s54_s9, 2048, %s56_s12, [#allocation9], %s401_s13, %s401_s13, %s402_s14  }
   0xf   :  { %387 = dma.done.wait [#allocation3], 128  }
  0x10   :  { %388 = vsyncadd [#allocation3], 4294967168 }
  0x11   :  { %389 = dma.done.wait [#allocation6], 4128  }
  0x12   :  { %390 = vsyncadd [#allocation6], 4294963168 }
  0x13   :  { %391 = dma.done.wait [#allocation9], 2048  }
  0x14   :  { %392 = vsyncadd [#allocation9], 4294965248  ;;  %v112_v0 = vld [vmem:[#allocation5 + $0xf8] sm:$0xff]  ;;  %v110_v1 = vld [vmem:[#allocation5 + $0xe8] sm:$0xff]  ;;  %s236_s18 = sshll.u32 %s462_s5, 4  ;;  %s237_s18 = int_to_ptr.hbm [resolvable:$true] %s236_s18 }
  0x15   :  { %139 = vmatpush.msra.mxu1 %v112_v0  ;;  %v108_v2 = vld [vmem:[#allocation5 + $0xd8] sm:$0xff]  ;;  %v106_v5 = vld [vmem:[#allocation5 + $0xc8] sm:$0xff]  ;;  %v111_v9 = vld [vmem:[#allocation5 + $0xf0] sm:$0xff] }
  0x16   :  { %v196_v3 = vld [vmem:[#allocation8 + $0x78] sm:$0xff]  ;;  %v195_v4 = vld [vmem:[#allocation8 + $0x70] sm:$0xff]  ;;  %v194_v6 = vld [vmem:[#allocation8 + $0x68] sm:$0xff]  ;;  %119 = vmatpush.msra.mxu0 %v111_v9 }
  0x17   :  { %140 = vmatpush.msra.mxu1 %v110_v1  ;;  %197 = vmatpush.msra.mxu2 %v196_v3  ;;  %v104_v7 = vld [vmem:[#allocation5 + $0xb8] sm:$0xff]  ;;  %v193_v8 = vld [vmem:[#allocation8 + $0x60] sm:$0xff]  ;;  %v107_v13 = vld [vmem:[#allocation5 + $0xd0] sm:$0xff] }
  0x18   :  { %v102_v10 = vld [vmem:[#allocation5 + $0xa8] sm:$0xff]  ;;  %v192_v11 = vld [vmem:[#allocation8 + $0x58] sm:$0xff]  ;;  %v191_v15 = vld [vmem:[#allocation8 + $0x50] sm:$0xff] }
  0x19   :  { %141 = vmatpush.msra.mxu1 %v108_v2  ;;  %198 = vmatpush.msra.mxu2 %v195_v4  ;;  %v109_v12 = vld [vmem:[#allocation5 + $0xe0] sm:$0xff]  ;;  %v100_v14 = vld [vmem:[#allocation5 + $0x98] sm:$0xff]  ;;  %v98_v17 = vld [vmem:[#allocation5 + $0x88] sm:$0xff] }
  0x1a   :  { %120 = vmatpush.msra.mxu0 %v109_v12  ;;  %v105_v16 = vld [vmem:[#allocation5 + $0xc0] sm:$0xff]  ;;  %v190_v18 = vld [vmem:[#allocation8 + $0x48] sm:$0xff]  ;;  %v96_v20 = vld [vmem:[#allocation5 + $0x78] sm:$0xff] }
  0x1b   :  { %142 = vmatpush.msra.mxu1 %v106_v5  ;;  %199 = vmatpush.msra.mxu2 %v194_v6  ;;  %v103_v19 = vld [vmem:[#allocation5 + $0xb0] sm:$0xff]  ;;  %v189_v21 = vld [vmem:[#allocation8 + $0x40] sm:$0xff]  ;;  %v446_v22 = vld [vmem:[#allocation2] sm:$0xff] }
  0x1c   :  { %121 = vmatpush.msra.mxu0 %v107_v13  ;;  %v101_v23 = vld [vmem:[#allocation5 + $0xa0] sm:$0xff]  ;;  %v94_v24 = vld [vmem:[#allocation5 + $0x68] sm:$0xff]  ;;  %v99_v26 = vld [vmem:[#allocation5 + $0x90] sm:$0xff]  ;;  %v178_v27 = vadd.f32 1e-06, %v446_v22 }
  0x1d   :  { %143 = vmatpush.msra.mxu1 %v104_v7  ;;  %200 = vmatpush.msra.mxu2 %v193_v8  ;;  %v188_v25 = vld [vmem:[#allocation8 + $0x38] sm:$0xff]  ;;  %v187_v29 = vld [vmem:[#allocation8 + $0x30] sm:$0xff]  ;;  %v90_v31 = vld [vmem:[#allocation5 + $0x48] sm:$0xff] }
  0x1e   :  { %122 = vmatpush.msra.mxu0 %v105_v16  ;;  %v92_v28 = vld [vmem:[#allocation5 + $0x58] sm:$0xff]  ;;  %v97_v30 = vld [vmem:[#allocation5 + $0x80] sm:$0xff]  ;;  %v186_v32 = vld [vmem:[#allocation8 + $0x28] sm:$0xff]  ;;  %259 = vlog2.f32 %v178_v27 }
  0x1f   :  { %144 = vmatpush.msra.mxu1 %v102_v10  ;;  %201 = vmatpush.msra.mxu2 %v192_v11  ;;  %v95_v33 = vld [vmem:[#allocation5 + $0x70] sm:$0xff]  ;;  %v88_v34 = vld [vmem:[#allocation5 + $0x38] sm:$0xff]  ;;  %v185_v35 = vld [vmem:[#allocation8 + $0x20] sm:$0xff] }
  0x20   :  { %123 = vmatpush.msra.mxu0 %v103_v19  ;;  %v93_v36 = vld [vmem:[#allocation5 + $0x60] sm:$0xff]  ;;  %v86_v37 = vld [vmem:[#allocation5 + $0x28] sm:$0xff]  ;;  %v91_v39 = vld [vmem:[#allocation5 + $0x50] sm:$0xff] }
  0x21   :  { %145 = vmatpush.msra.mxu1 %v100_v14  ;;  %202 = vmatpush.msra.mxu2 %v191_v15  ;;  %v184_v38 = vld [vmem:[#allocation8 + $0x18] sm:$0xff]  ;;  %v183_v41 = vld [vmem:[#allocation8 + $0x10] sm:$0xff]  ;;  %v82_v44 = vld [vmem:[#allocation5 + $0x8] sm:$0xff] }
  0x22   :  { %124 = vmatpush.msra.mxu0 %v101_v23  ;;  %v84_v40 = vld [vmem:[#allocation5 + $0x18] sm:$0xff]  ;;  %v89_v43 = vld [vmem:[#allocation5 + $0x40] sm:$0xff]  ;;  %v182_v45 = vld [vmem:[#allocation8 + $0x8] sm:$0xff] }
  0x23   :  { %146 = vmatpush.msra.mxu1 %v98_v17  ;;  %203 = vmatpush.msra.mxu2 %v190_v18  ;;  %v87_v46 = vld [vmem:[#allocation5 + $0x30] sm:$0xff]  ;;  %v181_v47 = vld [vmem:[#allocation8] sm:$0xff]  ;;  %v113_v52 = vld [vmem:[#allocation7] sm:$0x3] }
  0x24   :  { %125 = vmatpush.msra.mxu0 %v99_v26  ;;  %v260_v42 = vpop.eup %259  ;;  %v85_v49 = vld [vmem:[#allocation5 + $0x20] sm:$0xff]  ;;  %v83_v50 = vld [vmem:[#allocation5 + $0x10] sm:$0xff]  ;;  %v116_v53 = vperm.slane %v113_v52, 1  ;;  %v115_v62 = vperm.slane %v113_v52, 0  ;;  %v258_v63 = vld [vmem:[%s461_s4] ss:$0 sm:$0xff] }
  0x25   :  { %147 = vmatpush.msra.mxu1 %v96_v20  ;;  %204 = vmatpush.msra.mxu2 %v189_v21  ;;  %v180_v48 = vmul.f32 0.6931472, %v260_v42  ;;  %v81_v51 = vld [vmem:[#allocation5] sm:$0xff]  ;;  %s403_s4 = smov [#allocation10]  }
  0x26   :  { %126 = vmatpush.msra.mxu0 %v97_v30  ;;  %s234_s15 = sshll.u32 %s403_s4, 4  ;;  %s235_s15 = int_to_ptr.vmem [resolvable:$true] %s234_s15 }
  0x27   :  { %148 = vmatpush.msra.mxu1 %v94_v24  ;;  %205 = vmatpush.msra.mxu2 %v188_v25 }
  0x28   :  { %127 = vmatpush.msra.mxu0 %v95_v33 }
  0x29   :  { %149 = vmatpush.msra.mxu1 %v92_v28  ;;  %206 = vmatpush.msra.mxu2 %v187_v29 }
  0x2a   :  { %128 = vmatpush.msra.mxu0 %v93_v36 }
  0x2b   :  { %150 = vmatpush.msra.mxu1 %v90_v31  ;;  %207 = vmatpush.msra.mxu2 %v186_v32 }
  0x2c   :  { %129 = vmatpush.msra.mxu0 %v91_v39 }
  0x2d   :  { %151 = vmatpush.msra.mxu1 %v88_v34  ;;  %208 = vmatpush.msra.mxu2 %v185_v35 }
  0x2e   :  { %130 = vmatpush.msra.mxu0 %v89_v43 }
  0x2f   :  { %152 = vmatpush.msra.mxu1 %v86_v37  ;;  %209 = vmatpush.msra.mxu2 %v184_v38 }
  0x30   :  { %131 = vmatpush.msra.mxu0 %v87_v46 }
  0x31   :  { %153 = vmatpush.msra.mxu1 %v84_v40  ;;  %210 = vmatpush.msra.mxu2 %v183_v41 }
  0x32   :  { %132 = vmatpush.msra.mxu0 %v85_v49 }
  0x33   :  { %154 = vmatpush.msra.mxu1 %v82_v44  ;;  %211 = vmatpush.msra.mxu2 %v182_v45 }
  0x34   :  { %155 = vmatmul.f32.vlgmr.msra.gmra.mxu1 %v446_v22  ;;  %133 = vmatpush.msra.mxu0 %v83_v50 }
  0x35   :  { %212 = vmatpush.msra.mxu2 %v181_v47 }
  0x36   :  { %213 = vmatmul.f32.vlgmr.msra.gmra.mxu2 %v180_v48  ;;  %134 = vmatpush.msra.mxu0 %v81_v51 }
  0x37   :  { %135 = vmatmul.f32.vlgmr.msra.gmra.mxu0 %v446_v22 }
  0xb1   :  { %v156_v54 = vpop.f32.mrf.mxu1 }
  0xb2   :  { %v157_v55 = vadd.f32 %v156_v54, %v116_v53 }
  0xb4   :  { %v248_v56 = vmul.f32 -1.442695, %v157_v55  ;;  %v136_v1 = vpop.f32.mrf.mxu0 }
  0xb5   :  { %v137_v3 = vadd.f32 %v136_v1, %v115_v62 }
  0xb6   :  { %261 = vpow2.f32 %v248_v56 }
  0xb9   :  { %v214_v57 = vpop.f32.mrf.mxu2 }
  0xba   :  { %v217_v58 = vmul.f32 1.442695, %v214_v57 }
  0xbc   :  { %v262_v59 = vpop.eup %261  ;;  %263 = vpow2.f32 %v217_v58 }
  0xbd   :  { %v162_v60 = vadd.f32 1.0, %v262_v59 }
  0xbf   :  { %265 = vrcp.f32 %v162_v60  ;;  %v174_v6 = vand.u32 2147483648, %v162_v60  ;;  %v172_v8 = vand.u32 2147483647, %v162_v60  ;;  %vm168_vm1 = vweird.f32 %v162_v60 }
  0xc1   :  { %v175_v11 = vor.u32 1.1754944e-38, %v174_v6  ;;  %vm173_vm3 = vcmp.eq.f32.partialorder %v172_v8, 8.507059e+37 }
  0xc2   :  { %v264_v61 = vpop.eup %263 }
  0xc3   :  { %v223_v5 = vadd.f32 %v264_v61, %v258_v63 }
  0xc5   :  { %v266_v0 = vpop.eup %265  ;;  %v224_v10 = vsub.f32 %v137_v3, %v223_v5 }
  0xc6   :  { %v164_v2 = vmul.f32 %v266_v0, %v162_v60  ;;  %vm169_vm0 = vweird.f32 %v266_v0 }
  0xc7   :  { %vm170_vm2 = vmor %vm168_vm1, %vm169_vm0 }
  0xc8   :  { %v165_v4 = vsub.f32 1.0, %v164_v2 }
  0xca   :  { %v166_v7 = vmul.f32 %v266_v0, %v165_v4 }
  0xcc   :  { %v167_v9 = vadd.f32 %v266_v0, %v166_v7 }
  0xce   :  { %v171_v12 = vsel %vm170_vm2, %v266_v0, %v167_v9 }
  0xcf   :  { %v176_v13 = vsel %vm173_vm3, %v175_v11, %v171_v12 }
  0xd0   :  { %v225_v14 = vmul.f32 %v224_v10, %v176_v13 }
  0xd2   :  { %v226_v15 = vadd.f32 %v225_v14, %v223_v5 }
  0xd4   :  { %v227_v16 = vmax.f32 %v226_v15, 0.0 }
  0xd6   :  { %228 = vst [vmem:[#allocation10] sm:$0xff] %v227_v16 }
  0xd7   :  { %239 = dma.vmem_to_hbm [thread:$0]  %s235_s15, 128, %s237_s18, [#allocation4]  }
  0xd8   :  { %393 = dma.done.wait [#allocation4], 128  }
  0xd9   :  { %394 = vsyncadd [#allocation4], 4294967168 }
  0xda   :  { %244 = vsyncpa [#allocation3], 1 }
  0xdb   :  { %245 = vsyncpa [#allocation6], 1 }
  0xdc   :  { %246 = vsyncpa [#allocation9], 1 }
  0xdd   :  { %247 = vsyncpa [#allocation4], 1 }

</bundles_post_ra>
